<compile_context>
chip_gen: v7x
topology: tpu7x:2x2x1
jax: 0.10.0
libtpu: 0.0.40
codegen_flags: <defaults>
</compile_context>

<pallas_src>
import math

import jax
import jax.numpy as jnp
import numpy as np
from jax.experimental import pallas as pl
from jax.experimental.pallas import tpu as pltpu

_LANE = 128
_VMEM_BLOCK_BUDGET = 32 << 20   # combined double-buffered block footprint
_VMEM_LIMIT_BYTES = 64 << 20    # scoped VMEM limit (<= v7x physical 64 MiB)


# --------------------------------------------------------------------------
# Helpers
# --------------------------------------------------------------------------
def _round_up(x: int, m: int) -> int:
    return ((x + m - 1) // m) * m


def _pick_tiles(batch: int, n_slots: int, hw_pad: int, bytes_per_elem: int,
                budget: int = _VMEM_BLOCK_BUDGET):
    """Pick (batch_tile, hw_tile); no divisibility requirement (grid uses cdiv).

    `bytes_per_elem` = combined bytes of all double-buffered blocks per output
    element (e.g. (4 + out_itemsize) * 2 for the 'random' path).
    """
    per_item = n_slots * hw_pad * bytes_per_elem
    if per_item <= budget:
        bt = min(batch, max(1, budget // per_item))
        if batch >= 2:
            # Keep >= 2 grid steps on the parallel batch axis (v7x has 2 TCs).
            bt = min(bt, -(-batch // 2))
        return int(bt), int(hw_pad)
    # A single batch item exceeds the budget: tile the lane-dense HW axis
    # in 128-lane multiples (slot-axis reduction is independent per pixel).
    hw_tile = (budget // max(1, n_slots * bytes_per_elem)) // _LANE * _LANE
    hw_tile = int(min(max(hw_tile, _LANE), hw_pad))
    return 1, hw_tile


def _block_bounds(n_slots: int, n_cols: int, height: int, width: int):
    """Replicates the static Python loop in CreateRandomMaskPatterns ('blocks')."""
    blocks_per_col = n_slots // n_cols
    remainder = n_slots - blocks_per_col * n_cols
    bounds = []
    for col in range(n_cols):
        rows = blocks_per_col if col < n_cols - 1 else blocks_per_col + remainder
        for row in range(rows):
            block_width = math.ceil(width / n_cols)
            block_height = math.ceil(height / rows)
            x = col * block_width
            y = row * block_height
            # torch slice assignment clips to array bounds; clip here too.
            bounds.append(
                (y, min(y + block_height, height), x, min(x + block_width, width))
            )
    assert len(bounds) == n_slots
    return bounds  # list of (y0, y1, x0, x1), static Python ints


# --------------------------------------------------------------------------
# "random": normalize uniforms over the slot axis.  Block (bt, S, hw_tile).
# --------------------------------------------------------------------------
def _normalize_kernel(u_ref, o_ref):
    u = u_ref[...].astype(jnp.float32)            # (bt, S, hw_tile)
    denom = jnp.sum(u, axis=1, keepdims=True)     # (bt, 1, hw_tile)
    # Exact divide (HBM-bound kernel -> VALU divide is hidden; sums must be 1).
    o_ref[...] = (u / denom).astype(o_ref.dtype)


# Optional pure-TPU path: generate the uniforms in-kernel with the hardware
# PRNG (no HBM round trip for the randoms).  Seed arrives via scalar prefetch.
def _normalize_prng_kernel(seed_ref, o_ref):
    pltpu.prng_seed(seed_ref[0], pl.program_id(0), pl.program_id(1))
    bits = pltpu.bitcast(pltpu.prng_random_bits(o_ref.shape), jnp.uint32)
    fbits = (bits >> 9) | jnp.uint32(0x3F800000)          # mantissa trick
    u = pltpu.bitcast(fbits, jnp.float32) - 1.0            # U[0, 1)
    denom = jnp.sum(u, axis=1, keepdims=True)
    o_ref[...] = (u / denom).astype(o_ref.dtype)


# --------------------------------------------------------------------------
# "blocks": broadcast the precomputed (S, hw_tile) plane to (bt, S, hw_tile).
# Pure lane-dense store — the rasterization is hoisted to the host.
# --------------------------------------------------------------------------
def _broadcast_plane_kernel(plane_ref, o_ref):
    o_ref[...] = jnp.broadcast_to(plane_ref[...][None], o_ref.shape)


# --------------------------------------------------------------------------
# Wrapper (forward pass of CreateRandomMaskPatterns)
# --------------------------------------------------------------------------
def create_random_mask_patterns(
    masks: jnp.ndarray,
    pattern: str = "random",
    n_slots=None,
    n_cols: int = 2,
    seed: int = 0,
    use_hw_prng: bool = False,
) -> jnp.ndarray:
    """Forward pass of CreateRandomMaskPatterns. masks: (B, S, H, W)."""
    if pattern not in ("random", "blocks"):
        raise ValueError(f"Unknown pattern {pattern}")

    B, S, H, W = masks.shape
    HW = H * W
    hw_pad = _round_up(HW, _LANE)        # lane-dense last dim (unmasked stores)
    out_dtype = masks.dtype
    itemsize = np.dtype(out_dtype).itemsize
    cparams = pltpu.CompilerParams(
        dimension_semantics=("parallel", "parallel"),
        vmem_limit_bytes=_VMEM_LIMIT_BYTES,
    )

    if pattern == "random":
        if use_hw_prng:
            # In-kernel hardware PRNG: output traffic only (~1/3 of the HBM
            # traffic of the portable path).
            bt, hw_tile = _pick_tiles(B, S, hw_pad, itemsize * 2)
            grid = (pl.cdiv(B, bt), pl.cdiv(hw_pad, hw_tile))
            out = pl.pallas_call(
                _normalize_prng_kernel,
                out_shape=jax.ShapeDtypeStruct((B, S, hw_pad), out_dtype),
                grid_spec=pltpu.PrefetchScalarGridSpec(
                    num_scalar_prefetch=1,
                    grid=grid,
                    in_specs=[],
                    out_specs=pl.BlockSpec(
                        (bt, S, hw_tile), lambda i, j, seed_ref: (i, 0, j)),
                ),
                compiler_params=cparams,
            )(jnp.asarray([seed], dtype=jnp.int32))
        else:
            # Portable path: torch.rand_like(masks) -> wrapper-side uniforms.
            key = jax.random.PRNGKey(seed)
            u = jax.random.uniform(key, (B, S, hw_pad), dtype=jnp.float32)
            bt, hw_tile = _pick_tiles(B, S, hw_pad, (4 + itemsize) * 2)
            grid = (pl.cdiv(B, bt), pl.cdiv(hw_pad, hw_tile))
            out = pl.pallas_call(
                _normalize_kernel,
                out_shape=jax.ShapeDtypeStruct((B, S, hw_pad), out_dtype),
                grid=grid,
                in_specs=[pl.BlockSpec((bt, S, hw_tile), lambda i, j: (i, 0, j))],
                out_specs=pl.BlockSpec((bt, S, hw_tile), lambda i, j: (i, 0, j)),
                compiler_params=cparams,
            )(u)
        if hw_pad != HW:
            out = out[:, :, :HW]
        return out.reshape(B, S, H, W)

    # pattern == "blocks"
    n_slots_eff = S if n_slots is None else int(n_slots)
    bounds = _block_bounds(n_slots_eff, n_cols, H, W)

    # Host-side rasterization of the static rectangles (compile-time work).
    plane_np = np.zeros((n_slots_eff, hw_pad), dtype=np.float32)
    for s, (y0, y1, x0, x1) in enumerate(bounds):
        img = np.zeros((H, W), dtype=np.float32)
        img[y0:y1, x0:x1] = 1.0
        plane_np[s, :HW] = img.reshape(-1)
    plane = jnp.asarray(plane_np).astype(out_dtype)

    bt, hw_tile = _pick_tiles(B, n_slots_eff, hw_pad, itemsize * 2)
    grid = (pl.cdiv(B, bt), pl.cdiv(hw_pad, hw_tile))
    out = pl.pallas_call(
        _broadcast_plane_kernel,
        out_shape=jax.ShapeDtypeStruct((B, n_slots_eff, hw_pad), out_dtype),
        grid=grid,
        in_specs=[pl.BlockSpec((n_slots_eff, hw_tile), lambda i, j: (0, j))],
        out_specs=pl.BlockSpec((bt, n_slots_eff, hw_tile), lambda i, j: (i, 0, j)),
        compiler_params=cparams,
    )(plane)
    if hw_pad != HW:
        out = out[:, :, :HW]
    return out.reshape(B, n_slots_eff, H, W)


if __name__ == "__main__":
    key = jax.random.PRNGKey(0)
    B, S, H, W = 2, 4, 16, 16
    masks = jax.random.uniform(key, (B, S, H, W), dtype=jnp.float32)

    # --- random pattern ---
    out_random = jax.block_until_ready(
        create_random_mask_patterns(masks, pattern="random", seed=0)
    )
    assert out_random.shape == (B, S, H, W)
    sums_r = np.asarray(jnp.sum(out_random, axis=1))
    np.testing.assert_allclose(sums_r, np.ones_like(sums_r), rtol=1e-5, atol=1e-5)
    assert np.all(np.asarray(out_random) >= 0.0)

    # --- blocks pattern ---
    out_blocks = jax.block_until_ready(
        create_random_mask_patterns(masks, pattern="blocks", n_cols=2)
    )
    assert out_blocks.shape == (B, S, H, W)
    sums_b = np.asarray(jnp.sum(out_blocks, axis=1))
    np.testing.assert_allclose(sums_b, np.ones_like(sums_b), rtol=0, atol=0)

    print("KERNEL_OK")
</pallas_src>

<mosaic_0001>
module attributes {stable_mosaic.version = 11 : i64} {
  func.func @_normalize_kernel(%arg0: i32, %arg1: i32, %arg2: memref<1x4x256xf32, #tpu.memory_space<vmem>>, %arg3: memref<1x4x256xf32, #tpu.memory_space<vmem>>) attributes {dimension_semantics = [#tpu.dimension_semantics<parallel>, #tpu.dimension_semantics<parallel>], iteration_bounds = array<i64: 2, 1>, scalar_prefetch = 0 : i64, scratch_operands = 0 : i64, tpu.core_type = #tpu.core_type<tc>, window_params = [{transform_indices = @transform_0, window_bounds = array<i64: 1, 4, 256>}, {transform_indices = @transform_1, window_bounds = array<i64: 1, 4, 256>}]} {
    %c0 = arith.constant 0 : index
    %c0_0 = arith.constant 0 : index
    %c0_1 = arith.constant 0 : index
    %0 = vector.load %arg2[%c0, %c0_0, %c0_1] : memref<1x4x256xf32, #tpu.memory_space<vmem>>, vector<1x4x256xf32>
    %cst = arith.constant dense<0.000000e+00> : vector<1x256xf32>
    %1 = vector.multi_reduction <add>, %0, %cst [1] : vector<1x4x256xf32> to vector<1x256xf32>
    %2 = vector.shape_cast %1 : vector<1x256xf32> to vector<1x1x256xf32>
    %3 = vector.broadcast %2 : vector<1x1x256xf32> to vector<1x4x256xf32>
    %4 = arith.divf %0, %3 : vector<1x4x256xf32>
    %c0_2 = arith.constant 0 : index
    %c0_3 = arith.constant 0 : index
    %c0_4 = arith.constant 0 : index
    %5 = vector.load %arg3[%c0_2, %c0_3, %c0_4] : memref<1x4x256xf32, #tpu.memory_space<vmem>>, vector<1x4x256xf32>
    tpu.vector_store %arg3[%c0_2, %c0_3, %c0_4], %4 {strides = array<i32>} : memref<1x4x256xf32, #tpu.memory_space<vmem>>, vector<1x4x256xf32>,
    return
  }
  func.func @transform_0(%arg0: i32, %arg1: i32) -> (i32, i32, i32) {
    %c0_i32 = arith.constant 0 : i32
    %c0_i32_0 = arith.constant 0 : i32
    return %arg0, %c0_i32, %arg1 : i32, i32, i32
  }
  func.func @transform_1(%arg0: i32, %arg1: i32) -> (i32, i32, i32) {
    %c0_i32 = arith.constant 0 : i32
    %c0_i32_0 = arith.constant 0 : i32
    return %arg0, %c0_i32, %arg1 : i32, i32, i32
  }
}

</mosaic_0001>

<bundles_post_ra>
// kernel: tpu_custom_call.1
= control target key start
LH: loop header
LB: loop body
LE: loop exit
PB: predicated region body
PF: predicated region fallthrough
CT: control target
= control target key end

     0   :  { %6 = vsyncpa [#allocation3], 0  ;;  %s660_s0 = inlined_call_operand.hbm [shape: f32[2,4,256], index: 0, kind: input, shape index: {}]   ;;  %s661_s1 = inlined_call_operand.hbm [shape: f32[2,4,256], index: 1, kind: output, shape index: {}]  }
   0x1   :  { %8 = vsyncpa [#allocation3 + $0x1], 0 }
   0x2   :  { %9 = vsyncpa [#allocation4], 0 }
   0x3   :  { %11 = vsyncpa [#allocation4 + $0x1], 0  ;;  %s488_s6 = smov 0   ;;  %s490_s7 = smov 0  }
   0x4   :  { %s492_s8 = smov 0   ;;  %s494_s9 = smov 0  }
   0x5   :  { %s496_s10 = smov 0   ;;  %s498_s11 = smov 0  }
   0x6 LB: > { %s280_s12 = sadd.s32 4294967295, %s474_s11   ;;  %s281_s13 = sadd.s32 4294967294, %s474_s11   ;;  %s474_s11 = sphi %s498_s11, %s17_s11   ;;  %s470_s10 = sphi %s496_s10, %s677_s10   ;;  %s466_s9 = sphi %s494_s9, %s676_s9   ;;  %s462_s8 = sphi %s492_s8, %s675_s8   ;;  %s458_s7 = sphi %s490_s7, %s674_s7   ;;  %s454_s6 = sphi %s488_s6, %s673_s6  }
   0x7   : > { %s29_s14 = sadd.s32 1, %s470_s10  ;;  %s38_s15 = sadd.s32 1, %s462_s8 }
   0x8   : > { %p31_p0 = scmp.ge.s32.totalorder %s29_s14, 2  ;;  %p45_p1 = scmp.ne.s32.totalorder %s462_s8, %s458_s7 }
   0x9   : > { %p46_p2 = scmp.eq.s32.totalorder %s474_s11, 0  ;;  %p51_p3 = scmp.ne.s32.totalorder %s458_s7, %s454_s6 }
   0xa   : > { %s679_s14 = smov (%p31_p0, %s29_s14), 0  ;;  %p52_p5 = scmp.eq.s32.totalorder %s280_s12, 0 }
   0xb   : > { %p529_p4 = por %p46_p2, %p45_p1  ;;  %s33_s17 = ssub.s32 %s470_s10, %s679_s14 }
   0xc   : > { %p77_p6 = scmp.eq.s32.totalorder %s280_s12, 1  ;;  %p36_p7 = scmp.eq.s32.totalorder %s33_s17, 0 }
   0xd   : > { %p535_p8 = por %p52_p5, %p51_p3  ;;  %p83_p10 = scmp.eq.s32.totalorder %s281_s13, 1 }
   0xe   : > { %p539_p9 = por %p77_p6, %p45_p1  ;;  %p309_p13 = scmp.lt.s32.totalorder %s474_s11, 2 }
   0xf   : > { %s544_s20 = scalar_select %p36_p7, %s462_s8, %s38_s15  }
  0x10   : > { %s665_s19 = scalar_select %p539_p9, 1, 0 }
  0x11   : > { %p546_p11 = por %p83_p10, %p51_p3  ;;  %s103_s22 = sand.u32 1, %s462_s8  }
  0x12   : > { %s284_s23 = sshll.u32 %s103_s22, 3  ;;  %s295_s24 = sshll.u32 %s470_s10, 7 }
  0x13   : > { %s666_s21 = scalar_select %p546_p11, 1, 0 }
  0x14   : > { %s557_s27 = scalar_lea.hbm %s660_s0, %s295_s24  ;;  %s107_s28 = scalar_lea.vmem [#allocation2], %s284_s23 }
  0x15   : > { %s117_s29 = sshll.u32 %s107_s28, 4  ;;  %p563_p0 = pnand %p309_p13, %p529_p4  ;;  %s559_s29 = int_to_ptr.vmem [resolvable:$true] %s117_s29 }
  0x16   : > { %s104_s2 = scalar_lea.sflag [#allocation3], %s103_s22  ;;  %s362_s3 = scalar_lea.hbm %s557_s27, 128 }
  0x17   : > { %p363_p3 = scmp.ne.s32.totalorder %s557_s27, %s362_s3  ;;  %p364_p5 = pneg %p563_p0 }
  0x18   : > { %s367_s12 = scalar_lea.hbm %s660_s0, 256  ;;  %p368_p4 = scmp.lt.u32.totalorder %s557_s27, %s660_s0 }
  0x19   : > { %p365_p6 = pnand %p364_p5, %p363_p3  ;;  %p369_p10 = scmp.lt.u32.totalorder %s367_s12, %s362_s3 }
  0x1a   : > { %p371_p12 = scmp.lt.u32.totalorder %s362_s3, %s557_s27 }
  0x1b   : > { %p366_p7 = pneg %p365_p6  ;;  %p370_p13 = por %p369_p10, %p368_p4 }
  0x1d   : > { %p372_p1 = por %p371_p12, %p370_p13 }
  0x1f   : > { %p373_p2 = pnand %p372_p1, %p366_p7 }
  0x21   : > { %376 = shalt.err (!%p373_p2)
}
  0x22   : > { %s377_s16 = scalar_lea.vmem %s559_s29, 128  ;;  %s476_s17 = smov [#allocation2]  }
  0x23   : > { %p378_p3 = scmp.ne.s32.totalorder %s559_s29, %s377_s16  ;;  %s382_s22 = sshll.u32 %s476_s17, 4  ;;  %s383_s22 = int_to_ptr.vmem [resolvable:$false] %s382_s22 }
  0x24   : > { %s384_s23 = scalar_lea.vmem %s383_s22, 256  ;;  %p385_p9 = scmp.lt.s32.totalorder %s559_s29, %s383_s22 }
  0x25   : > { %p380_p6 = pnand %p378_p3, %p364_p5  ;;  %p386_p4 = scmp.lt.s32.totalorder %s384_s23, %s377_s16 }
  0x27   : > { %p381_p11 = pneg %p380_p6  ;;  %p387_p10 = por %p386_p4, %p385_p9 }
  0x29   : > { %p388_p12 = pnand %p387_p10, %p381_p11 }
  0x2b   : > { %391 = shalt.err (!%p388_p12)
}
  0x2c   : > { %304 = dma.hbm_to_vmem [thread:$0]  (!%p563_p0), %s557_s27, 128, %s559_s29, %s104_s2  }
  0x2d   : > { %p668_p1 = scmp.lt.s32.totalorder %s474_s11, 3  ;;  %p669_p2 = scmp.ge.s32.totalorder %s474_s11, 1 }
  0x2f   : > { %p123_p5 = pnand %p669_p2, %p668_p1 }
  0x30   : > { %s599_s24 = sand.u32 (!%p123_p5), 1, %s458_s7  }
  0x31   : > { %126 = sbr.rel (%p123_p5) target bundleno = 102 (0x66), region = 24  ;;  %s288_s25 = sshll.u32 (!%p123_p5), %s599_s24, 3 }
  0x32   : > { %s129_s26 = scalar_lea.sflag (!%p123_p5), [#allocation3], %s599_s24  ;;  %s132_s28 = scalar_lea.vmem (!%p123_p5), [#allocation2], %s288_s25 }
  0x38   : > { %445 = dma.done.wait (%p535_p8), %s129_s26, 128  }
  0x39   : > { %447 = vsyncadd (%p535_p8), %s129_s26, 4294967168  ;;  %vm157_vm0 = vcmask 1043456   ;;  %v153_v0 = vld [vmem:[%s132_s28] sm:$0xff]  ;;  %s150_s18 = scalar_lea.vmem [#allocation5], %s288_s25  ;;  %s296_s29 = sshll.u32 %s466_s9, 7 }
  0x3a   : > { %v155_v1 = vcombine.high %v153_v0, %v153_v0  ;;  %v158_v2 = vsel %vm157_vm0, %v153_v0, 0.0  ;;  %s196_s27 = sshll.u32 %s150_s18, 4  ;;  %s613_s3 = scalar_lea.hbm %s661_s1, %s296_s29  ;;  %s608_s27 = int_to_ptr.vmem [resolvable:$true] %s196_s27 }
  0x3b   : > { %v159_v3 = vrot.slane %v158_v2, 4  ;;  %s180_s4 = scalar_lea.sflag [#allocation4], %s599_s24  ;;  %s392_s5 = scalar_lea.vmem %s608_s27, 128 }
  0x3c   : > { %v165_v4 = vsel %vm157_vm0, %v155_v1, 0.0  ;;  %p393_p8 = scmp.ne.s32.totalorder %s608_s27, %s392_s5  ;;  %p670_p9 = scmp.ne.s32.totalorder %s665_s19, 0 }
  0x3d   : > { %v160_v5 = vadd.f32 %v159_v3, %v158_v2  ;;  %v166_v6 = vrot.slane %v165_v4, 4  ;;  %s477_s9 = smov [#allocation5]  }
  0x3e   : > { %p394_p11 = pnand %p393_p8, %p670_p9  ;;  %s396_s12 = sshll.u32 %s477_s9, 4  ;;  %s397_s12 = int_to_ptr.vmem [resolvable:$false] %s396_s12 }
  0x3f   : > { %v161_v7 = vrot.slane %v160_v5, 2  ;;  %v167_v8 = vadd.f32 %v166_v6, %v165_v4  ;;  %s398_s13 = scalar_lea.vmem %s397_s12, 256  ;;  %p399_p7 = scmp.lt.s32.totalorder %s608_s27, %s397_s12 }
  0x40   : > { %p395_p0 = pneg %p394_p11  ;;  %p400_p13 = scmp.lt.s32.totalorder %s398_s13, %s392_s5 }
  0x41   : > { %v162_v9 = vadd.f32 %v161_v7, %v160_v5  ;;  %v168_v10 = vrot.slane %v167_v8, 2 }
  0x42   : > { %p401_p3 = por %p400_p13, %p399_p7 }
  0x43   : > { %v163_v11 = vrot.slane %v162_v9, 1  ;;  %v169_v12 = vadd.f32 %v168_v10, %v167_v8 }
  0x44   : > { %p402_p6 = pnand %p401_p3, %p395_p0 }
  0x45   : > { %v164_v13 = vadd.f32 %v163_v11, %v162_v9  ;;  %v170_v14 = vrot.slane %v169_v12, 1 }
  0x47   : > { %v171_v15 = vadd.f32 %v170_v14, %v169_v12 }
  0x49   : > { %v174_v16 = vcombine.low %v164_v13, %v171_v15 }
  0x4b   : > { %360 = vrcp.f32 %v174_v16 }
  0x55   : > { %v361_v17 = vpop.eup %360 }
  0x56   : > { %v177_v18 = vmul.f32 %v361_v17, %v153_v0 }
  0x58   : > { %178 = vst [vmem:[%s150_s18] sm:$0xff] %v177_v18 }
  0x59   : > { %405 = shalt.err (!%p402_p6)
}
  0x5a   : > { %s406_s15 = scalar_lea.hbm %s613_s3, 128  ;;  %s410_s22 = scalar_lea.hbm %s661_s1, 256 }
  0x5b   : > { %p407_p4 = scmp.ne.s32.totalorder %s613_s3, %s406_s15  ;;  %p411_p1 = scmp.lt.u32.totalorder %s613_s3, %s661_s1 }
  0x5c   : > { %p412_p2 = scmp.lt.u32.totalorder %s410_s22, %s406_s15  ;;  %p414_p8 = scmp.lt.u32.totalorder %s406_s15, %s613_s3 }
  0x5d   : > { %p408_p10 = pnand %p407_p4, %p670_p9 }
  0x5e   : > { %p413_p5 = por %p412_p2, %p411_p1 }
  0x5f   : > { %p409_p12 = pneg %p408_p10 }
  0x60   : > { %p415_p11 = por %p414_p8, %p413_p5 }
  0x62   : > { %p416_p0 = pnand %p415_p11, %p409_p12 }
  0x64   : > { %419 = shalt.err (!%p416_p0)
}
  0x65   : > { %299 = dma.vmem_to_hbm [thread:$0]  (%p670_p9), %s608_s27, 128, %s613_s3, %s180_s4  }
  0x66 PF: > { %s208_s25 = sand.u32 1, %s454_s6   ;;  %p671_p7 = scmp.ne.s32.totalorder %s666_s21, 0 }
  0x67   : > { %p672_p13 = scmp.ge.s32.totalorder %s474_s11, 2  ;;  %s209_s26 = scalar_lea.sflag [#allocation4], %s208_s25 }
  0x69   : > { %p306_p3 = pnand %p672_p13, %p671_p7 }
  0x6b   : > { %449 = dma.done.wait (!%p306_p3), %s209_s26, 128  }
  0x6c   : > { %451 = vsyncadd (!%p306_p3), %s209_s26, 4294967168  ;;  %s17_s11 = sadd.s32 1, %s474_s11   ;;  %s673_s6 = smov %s458_s7 }
  0x6d   : > { %p14_p6 = scmp.ge.s32.totalorder %s17_s11, 4   ;;  %s674_s7 = smov %s462_s8 }
  0x6e   : > { %s675_s8 = smov %s544_s20  ;;  %s676_s9 = smov %s470_s10 }
  0x6f   : > { %s677_s10 = smov %s679_s14  ;;  %16 = sbr.rel (!%p14_p6) target bundleno = 6 (0x6), region = 69 }
  0x76   :  { %214 = vsyncpa [#allocation3], 1 }
  0x77   :  { %216 = vsyncpa [#allocation3 + $0x1], 1 }
  0x78   :  { %217 = vsyncpa [#allocation4], 1 }
  0x79   :  { %219 = vsyncpa [#allocation4 + $0x1], 1 }

</bundles_post_ra>
